<compile_context>
chip_gen: v7x
topology: tpu7x:2x2x1
jax: 0.10.0
libtpu: 0.0.40
codegen_flags: <defaults>
</compile_context>

<pallas_src>
import functools

import jax
import jax.numpy as jnp
from jax import lax
from jax.experimental import pallas as pl
from jax.experimental.pallas import tpu as pltpu


_SIGN_MASK = 0x7FFFFFFF          # int32: all bits except the sign bit
_KEY_NEG_INF = -2139095041       # monotone int32 key of float32 -inf
_KEY_POS_INF = 2139095040        # monotone int32 key of float32 +inf


def _combined_temporal_loss_kernel(slab_ref, thr_ref, out_ref, *,
                                   alpha, gamma, temporal_weight, margin, N):
    # Lane-dense rows of the packed (3, N) slab.
    l0 = slab_ref[0:1, :]            # class-0 logits
    l1 = slab_ref[1:2, :]            # class-1 logits
    t = slab_ref[2:3, :]             # targets in {0, 1}, f32
    thr = thr_ref[0, 0]              # learned threshold (SMEM scalar)

    inv_n = 1.0 / N                  # compile-time constant

    # ---------------- TemporalFocalLoss (C == 2 exploited) ----------------
    m = jnp.maximum(l0, l1)
    e0 = jnp.exp(l0 - m)
    e1 = jnp.exp(l1 - m)
    sum_e = e0 + e1
    inv_sum = 1.0 / sum_e            # exact division (parity with reference)
    lse = m + jnp.log(sum_e)

    logit_t = l0 + t * (l1 - l0)     # logit of the true class
    ce = lse - logit_t               # per-sample cross entropy
    pt = (e0 + t * (e1 - e0)) * inv_sum          # == exp(-ce); reuses the exps

    one_minus_pt = jnp.maximum(1.0 - pt, 0.0)
    if gamma == 2.0:
        focal_w = one_minus_pt * one_minus_pt
    elif float(gamma).is_integer():
        focal_w = lax.integer_pow(one_minus_pt, int(gamma))
    else:
        focal_w = one_minus_pt ** gamma
    focal = alpha * focal_w * ce

    minority = e1 * inv_sum          # softmax prob of class 1, (1, N)

    # ---------------- AdaptiveThresholdLoss: elementwise part ----------------
    # One shared exp for sigmoid AND the BCE-with-logits softplus tail.
    z = l1
    s = jnp.exp(-jnp.abs(z))                 # exp(-|z|)
    inv_1ps = 1.0 / (1.0 + s)
    sig = jnp.where(z >= 0.0, inv_1ps, s * inv_1ps)      # stable sigmoid
    pred = (sig > thr).astype(jnp.float32)
    mismatch = jnp.abs(t - pred)             # pred, t in {0,1}
    bce_elem = jnp.maximum(z, 0.0) - z * t + jnp.log1p(s)

    # ---------------- fused 1/N reductions ----------------
    # mean(focal*(1+t)) + mean(bce_elem) + 0.3*100*mean(|t-pred|)  in one pass.
    # (BCE(pred, t) with pred in {0,1} reduces to 100*mean(|t-pred|) because
    #  PyTorch clamps log at -100; keep that invariant if preds ever go soft.)
    per_elem = focal * (1.0 + t) + bce_elem + 30.0 * mismatch
    mean_part = jnp.sum(per_elem) * inv_n

    sum_t = jnp.sum(t)
    mean_t = sum_t / N               # exact division: keeps floor-index parity

    # ---------------- temporal consistency term ----------------
    if N > 1:
        temp_diff = jnp.abs(minority[:, 1:] - minority[:, :-1])
        temp_loss = jnp.sum(temp_diff) * (1.0 / (N - 1))
    else:
        temp_loss = jnp.float32(0.0)

    # ---------------- order statistic: sorted(p)[idx] without sort / (N,N) ----------
    # sigmoid is monotone, so select the idx-th smallest class-1 LOGIT via an exact
    # 34-step bisection over monotone int32 keys, then read its sigmoid value.
    zi = pltpu.bitcast(z, jnp.int32)
    keys = zi ^ ((zi >> 31) & _SIGN_MASK)    # monotone total order as signed int32

    idx_f = jnp.floor(N * (1.0 - mean_t))    # matches reference float math
    valid = idx_f < float(N)
    rank = idx_f + 1.0                       # 1-based rank of the order statistic

    def bisect(_, carry):
        lo, hi = carry
        mid = (lo & hi) + ((lo ^ hi) >> 1)   # overflow-free floor((lo+hi)/2)
        c = jnp.sum(jnp.where(keys <= mid, 1.0, 0.0))
        go_hi = c >= rank
        lo = jnp.where(go_hi, lo, mid + 1)
        hi = jnp.where(go_hi, mid, hi)
        return lo, hi

    _, opt_key = lax.fori_loop(
        0, 34, bisect, (jnp.int32(_KEY_NEG_INF), jnp.int32(_KEY_POS_INF)))

    # Snap to the exact data value: among elements with z >= opt value, the minimum
    # sigmoid equals sorted(p)[idx].  (No scalar transcendental, no reverse bitcast.)
    opt_p = jnp.min(jnp.where(keys >= opt_key, sig, jnp.inf))
    opt_safe = jnp.where(valid, opt_p, thr)  # keep untaken branch finite
    diff = thr - opt_safe
    threshold_update = jnp.where(valid, diff * diff, 0.0)

    threshold_penalty = jnp.maximum(jnp.abs(thr - 0.5) - margin, 0.0)

    total = (mean_part
             + temporal_weight * temp_loss
             + 0.2 * threshold_update
             + 0.1 * threshold_penalty)
    out_ref[...] = jnp.full((1, 1), total, dtype=jnp.float32)


def combined_temporal_loss(logits, targets, threshold,
                           alpha=0.25, gamma=2.0, temporal_weight=0.2,
                           margin=0.1):
    """Returns (total_loss_scalar, threshold_value) like the PyTorch module."""
    N, C = logits.shape
    assert C == 2, "CombinedTemporalLoss is a binary (2-class) loss"

    logits_f = logits.astype(jnp.float32)
    # Single packed lane-dense slab: rows = [class-0 logits, class-1 logits, targets].
    slab = jnp.concatenate(
        [logits_f.T, targets.astype(jnp.float32).reshape(1, N)], axis=0)   # (3, N)
    thr = jnp.asarray(threshold, jnp.float32).reshape(1, 1)

    kernel = functools.partial(
        _combined_temporal_loss_kernel,
        alpha=float(alpha), gamma=float(gamma),
        temporal_weight=float(temporal_weight), margin=float(margin), N=N)

    out = pl.pallas_call(
        kernel,
        out_shape=jax.ShapeDtypeStruct((1, 1), jnp.float32),
        in_specs=[
            pl.BlockSpec(memory_space=pltpu.MemorySpace.VMEM),   # packed (3, N) slab
            pl.BlockSpec(memory_space=pltpu.MemorySpace.SMEM),   # threshold scalar
        ],
        out_specs=pl.BlockSpec(memory_space=pltpu.MemorySpace.VMEM),
    )(slab, thr)

    total = out[0, 0]
    # jit-safe: return the jnp scalar (no float() on possibly-traced values).
    return total, thr[0, 0]


# ---------------- pure-JAX reference (for correctness check) ----------------
def _ref_loss(logits, targets, threshold,
              alpha=0.25, gamma=2.0, temporal_weight=0.2, margin=0.1):
    logits = logits.astype(jnp.float32)
    t = targets.astype(jnp.float32)
    N = logits.shape[0]

    logp = jax.nn.log_softmax(logits, axis=1)
    ce = -jnp.take_along_axis(logp, targets[:, None].astype(jnp.int32), axis=1)[:, 0]
    pt = jnp.exp(-ce)
    focal = alpha * (1.0 - pt) ** gamma * ce
    probs = jax.nn.softmax(logits, axis=1)
    mp = probs[:, 1]
    temp_loss = jnp.mean(jnp.abs(mp[1:] - mp[:-1])) if N > 1 else jnp.float32(0.0)
    weighted_focal = jnp.mean(focal * (1.0 + (t == 1.0).astype(jnp.float32)))
    focal_total = weighted_focal + temporal_weight * temp_loss

    z = logits[:, 1]
    p = jax.nn.sigmoid(z)
    pred = (p > threshold).astype(jnp.float32)
    tl = -jnp.mean(t * jnp.maximum(jnp.log(pred), -100.0)
                   + (1.0 - t) * jnp.maximum(jnp.log(1.0 - pred), -100.0))
    bce = jnp.mean(jnp.maximum(z, 0.0) - z * t + jnp.log1p(jnp.exp(-jnp.abs(z))))
    ps = jnp.sort(p)
    idx = jnp.floor(N * (1.0 - jnp.mean(t))).astype(jnp.int32)
    opt = ps[jnp.minimum(idx, N - 1)]
    tu = jnp.where(idx < N, (threshold - opt) ** 2, 0.0)
    pen = jnp.maximum(jnp.abs(threshold - 0.5) - margin, 0.0)
    thr_total = bce + 0.3 * tl + 0.2 * tu + 0.1 * pen
    return focal_total + thr_total


if __name__ == "__main__":
    key = jax.random.PRNGKey(0)
    k1, k2, k3, k4 = jax.random.split(key, 4)
    init_threshold = 0.5              # deterministic nn.Parameter init

    # Case 1: small sequence consistent with the module (seq=8 samples, 2 classes).
    N1 = 8
    logits1 = jax.random.normal(k1, (N1, 2), dtype=jnp.float32)
    targets1 = jax.random.randint(k2, (N1,), 0, 2, dtype=jnp.int32)
    total1, thr1 = combined_temporal_loss(logits1, targets1, init_threshold)
    total1 = jax.block_until_ready(total1)
    ref1 = jax.block_until_ready(_ref_loss(logits1, targets1, init_threshold))
    assert jnp.allclose(total1, ref1, rtol=1e-4, atol=1e-4), (float(total1), float(ref1))
    assert float(thr1) == init_threshold

    # Case 2: slightly larger / class-imbalanced, exercises the order-statistic search.
    N2 = 200
    logits2 = 3.0 * jax.random.normal(k3, (N2, 2), dtype=jnp.float32)
    targets2 = (jax.random.uniform(k4, (N2,)) < 0.2).astype(jnp.int32)
    total2, _ = combined_temporal_loss(logits2, targets2, init_threshold)
    total2 = jax.block_until_ready(total2)
    ref2 = jax.block_until_ready(_ref_loss(logits2, targets2, init_threshold))
    assert jnp.allclose(total2, ref2, rtol=1e-4, atol=1e-4), (float(total2), float(ref2))

    print("KERNEL_OK")
</pallas_src>

<mosaic_0001>
module attributes {stable_mosaic.version = 11 : i64} {
  func.func @_combined_temporal_loss_kernel(%arg0: memref<3x8xf32, #tpu.memory_space<vmem>>, %arg1: memref<1x1xf32, #tpu.memory_space<smem>>, %arg2: memref<1x1xf32, #tpu.memory_space<vmem>>) attributes {dimension_semantics = [], scalar_prefetch = 0 : i64, scratch_operands = 0 : i64, tpu.core_type = #tpu.core_type<tc>} {
    %c0 = arith.constant 0 : index
    %c0_0 = arith.constant 0 : index
    %0 = vector.load %arg0[%c0, %c0_0] : memref<3x8xf32, #tpu.memory_space<vmem>>, vector<1x8xf32>
    %c1 = arith.constant 1 : index
    %c0_1 = arith.constant 0 : index
    %1 = vector.load %arg0[%c1, %c0_1] : memref<3x8xf32, #tpu.memory_space<vmem>>, vector<1x8xf32>
    %c2 = arith.constant 2 : index
    %c0_2 = arith.constant 0 : index
    %2 = vector.load %arg0[%c2, %c0_2] : memref<3x8xf32, #tpu.memory_space<vmem>>, vector<1x8xf32>
    %c0_3 = arith.constant 0 : index
    %c0_4 = arith.constant 0 : index
    %3 = memref.load %arg1[%c0_3, %c0_4] : memref<1x1xf32, #tpu.memory_space<smem>>
    %4 = arith.maximumf %0, %1 : vector<1x8xf32>
    %5 = arith.subf %0, %4 : vector<1x8xf32>
    %6 = math.exp %5 : vector<1x8xf32>
    %7 = arith.subf %1, %4 : vector<1x8xf32>
    %8 = math.exp %7 : vector<1x8xf32>
    %9 = arith.addf %6, %8 : vector<1x8xf32>
    %cst = arith.constant 1.000000e+00 : f32
    %10 = vector.broadcast %cst : f32 to vector<1x8xf32>
    %11 = arith.divf %10, %9 : vector<1x8xf32>
    %12 = math.log %9 : vector<1x8xf32>
    %13 = arith.addf %4, %12 : vector<1x8xf32>
    %14 = arith.subf %1, %0 : vector<1x8xf32>
    %15 = arith.mulf %2, %14 : vector<1x8xf32>
    %16 = arith.addf %0, %15 : vector<1x8xf32>
    %17 = arith.subf %13, %16 : vector<1x8xf32>
    %18 = arith.subf %8, %6 : vector<1x8xf32>
    %19 = arith.mulf %2, %18 : vector<1x8xf32>
    %20 = arith.addf %6, %19 : vector<1x8xf32>
    %21 = arith.mulf %20, %11 : vector<1x8xf32>
    %cst_5 = arith.constant 1.000000e+00 : f32
    %22 = vector.broadcast %cst_5 : f32 to vector<1x8xf32>
    %23 = arith.subf %22, %21 : vector<1x8xf32>
    %cst_6 = arith.constant 0.000000e+00 : f32
    %24 = vector.broadcast %cst_6 : f32 to vector<1x8xf32>
    %25 = arith.maximumf %23, %24 : vector<1x8xf32>
    %26 = arith.mulf %25, %25 : vector<1x8xf32>
    %cst_7 = arith.constant 2.500000e-01 : f32
    %27 = vector.broadcast %cst_7 : f32 to vector<1x8xf32>
    %28 = arith.mulf %27, %26 : vector<1x8xf32>
    %29 = arith.mulf %28, %17 : vector<1x8xf32>
    %30 = arith.mulf %8, %11 : vector<1x8xf32>
    %31 = math.absf %1 : vector<1x8xf32>
    %cst_8 = arith.constant 0.000000e+00 : f32
    %32 = vector.broadcast %cst_8 : f32 to vector<1x8xf32>
    %33 = arith.subf %32, %31 : vector<1x8xf32>
    %34 = math.exp %33 : vector<1x8xf32>
    %cst_9 = arith.constant 1.000000e+00 : f32
    %35 = vector.broadcast %cst_9 : f32 to vector<1x8xf32>
    %36 = arith.addf %35, %34 : vector<1x8xf32>
    %cst_10 = arith.constant 1.000000e+00 : f32
    %37 = vector.broadcast %cst_10 : f32 to vector<1x8xf32>
    %38 = arith.divf %37, %36 : vector<1x8xf32>
    %cst_11 = arith.constant 0.000000e+00 : f32
    %39 = vector.broadcast %cst_11 : f32 to vector<1x8xf32>
    %40 = arith.cmpf oge, %1, %39 : vector<1x8xf32>
    %41 = arith.mulf %34, %38 : vector<1x8xf32>
    %42 = arith.select %40, %38, %41 : vector<1x8xi1>, vector<1x8xf32>
    %43 = vector.broadcast %3 : f32 to vector<1x8xf32>
    %44 = arith.cmpf ogt, %42, %43 : vector<1x8xf32>
    %45 = arith.extui %44 : vector<1x8xi1> to vector<1x8xi32>
    %46 = arith.sitofp %45 : vector<1x8xi32> to vector<1x8xf32>
    %47 = arith.subf %2, %46 : vector<1x8xf32>
    %48 = math.absf %47 : vector<1x8xf32>
    %cst_12 = arith.constant 0.000000e+00 : f32
    %49 = vector.broadcast %cst_12 : f32 to vector<1x8xf32>
    %50 = arith.maximumf %1, %49 : vector<1x8xf32>
    %51 = arith.mulf %1, %2 : vector<1x8xf32>
    %52 = arith.subf %50, %51 : vector<1x8xf32>
    %53 = math.log1p %34 : vector<1x8xf32>
    %54 = arith.addf %52, %53 : vector<1x8xf32>
    %cst_13 = arith.constant 1.000000e+00 : f32
    %55 = vector.broadcast %cst_13 : f32 to vector<1x8xf32>
    %56 = arith.addf %55, %2 : vector<1x8xf32>
    %57 = arith.mulf %29, %56 : vector<1x8xf32>
    %58 = arith.addf %57, %54 : vector<1x8xf32>
    %cst_14 = arith.constant 3.000000e+01 : f32
    %59 = vector.broadcast %cst_14 : f32 to vector<1x8xf32>
    %60 = arith.mulf %59, %48 : vector<1x8xf32>
    %61 = arith.addf %58, %60 : vector<1x8xf32>
    %62 = vector.shape_cast %61 : vector<1x8xf32> to vector<1x1x8xf32>
    %cst_15 = arith.constant dense<0.000000e+00> : vector<1xf32>
    %63 = vector.multi_reduction <add>, %62, %cst_15 [1, 2] : vector<1x1x8xf32> to vector<1xf32>
    %64 = vector.shape_cast %63 : vector<1xf32> to vector<1x1x1xf32>
    %65 = vector.extract %64[0, 0, 0] : f32 from vector<1x1x1xf32>
    %cst_16 = arith.constant 1.250000e-01 : f32
    %66 = arith.mulf %65, %cst_16 : f32
    %67 = vector.shape_cast %2 : vector<1x8xf32> to vector<1x1x8xf32>
    %cst_17 = arith.constant dense<0.000000e+00> : vector<1xf32>
    %68 = vector.multi_reduction <add>, %67, %cst_17 [1, 2] : vector<1x1x8xf32> to vector<1xf32>
    %69 = vector.shape_cast %68 : vector<1xf32> to vector<1x1x1xf32>
    %70 = vector.extract %69[0, 0, 0] : f32 from vector<1x1x1xf32>
    %cst_18 = arith.constant 8.000000e+00 : f32
    %71 = arith.divf %70, %cst_18 : f32
    %72 = vector.extract_strided_slice %30 {offsets = [0, 1], sizes = [1, 7], strides = [1, 1]} : vector<1x8xf32> to vector<1x7xf32>
    %73 = vector.extract_strided_slice %30 {offsets = [0, 0], sizes = [1, 7], strides = [1, 1]} : vector<1x8xf32> to vector<1x7xf32>
    %74 = arith.subf %72, %73 : vector<1x7xf32>
    %75 = math.absf %74 : vector<1x7xf32>
    %76 = vector.shape_cast %75 : vector<1x7xf32> to vector<1x1x7xf32>
    %cst_19 = arith.constant dense<0.000000e+00> : vector<1xf32>
    %77 = vector.multi_reduction <add>, %76, %cst_19 [1, 2] : vector<1x1x7xf32> to vector<1xf32>
    %78 = vector.shape_cast %77 : vector<1xf32> to vector<1x1x1xf32>
    %79 = vector.extract %78[0, 0, 0] : f32 from vector<1x1x1xf32>
    %cst_20 = arith.constant 0.142857149 : f32
    %80 = arith.mulf %79, %cst_20 : f32
    %81 = tpu.bitcast %1 : vector<1x8xf32> -> vector<1x8xi32>
    %c31_i32 = arith.constant 31 : i32
    %82 = vector.broadcast %c31_i32 : i32 to vector<1x8xi32>
    %83 = arith.shrsi %81, %82 : vector<1x8xi32>
    %c2147483647_i32 = arith.constant 2147483647 : i32
    %84 = vector.broadcast %c2147483647_i32 : i32 to vector<1x8xi32>
    %85 = arith.andi %83, %84 : vector<1x8xi32>
    %86 = arith.xori %81, %85 : vector<1x8xi32>
    %cst_21 = arith.constant 1.000000e+00 : f32
    %87 = arith.subf %cst_21, %71 : f32
    %cst_22 = arith.constant 8.000000e+00 : f32
    %88 = arith.mulf %cst_22, %87 : f32
    %89 = math.floor %88 : f32
    %cst_23 = arith.constant 8.000000e+00 : f32
    %90 = arith.cmpf olt, %89, %cst_23 : f32
    %cst_24 = arith.constant 1.000000e+00 : f32
    %91 = arith.addf %89, %cst_24 : f32
    %c-2139095041_i32 = arith.constant -2139095041 : i32
    %c2139095040_i32 = arith.constant 2139095040 : i32
    %c0_i32 = arith.constant 0 : i32
    %c34_i32 = arith.constant 34 : i32
    %92 = arith.addi %c0_i32, %c34_i32 : i32
    %c1_i32 = arith.constant 1 : i32
    %93:2 = scf.for %arg3 = %c0_i32 to %92 step %c1_i32 iter_args(%arg4 = %c-2139095041_i32, %arg5 = %c2139095040_i32) -> (i32, i32)  : i32 {
      %118 = arith.andi %arg4, %arg5 : i32
      %119 = arith.xori %arg4, %arg5 : i32
      %c1_i32_36 = arith.constant 1 : i32
      %120 = arith.shrsi %119, %c1_i32_36 : i32
      %121 = arith.addi %118, %120 : i32
      %122 = vector.broadcast %121 : i32 to vector<1x8xi32>
      %123 = arith.cmpi sle, %86, %122 : vector<1x8xi32>
      %cst_37 = arith.constant 1.000000e+00 : f32
      %cst_38 = arith.constant 0.000000e+00 : f32
      %124 = vector.broadcast %cst_37 : f32 to vector<1x8xf32>
      %125 = vector.broadcast %cst_38 : f32 to vector<1x8xf32>
      %126 = arith.select %123, %124, %125 : vector<1x8xi1>, vector<1x8xf32>
      %127 = vector.shape_cast %126 : vector<1x8xf32> to vector<1x1x8xf32>
      %cst_39 = arith.constant dense<0.000000e+00> : vector<1xf32>
      %128 = vector.multi_reduction <add>, %127, %cst_39 [1, 2] : vector<1x1x8xf32> to vector<1xf32>
      %129 = vector.shape_cast %128 : vector<1xf32> to vector<1x1x1xf32>
      %130 = vector.extract %129[0, 0, 0] : f32 from vector<1x1x1xf32>
      %131 = arith.cmpf oge, %130, %91 : f32
      %c1_i32_40 = arith.constant 1 : i32
      %132 = arith.addi %121, %c1_i32_40 : i32
      %133 = arith.select %131, %arg4, %132 : i32
      %134 = arith.select %131, %121, %arg5 : i32
      scf.yield %133, %134 : i32, i32
    }
    %94 = vector.broadcast %93#1 : i32 to vector<1x8xi32>
    %95 = arith.cmpi sge, %86, %94 : vector<1x8xi32>
    %cst_25 = arith.constant 0x7F800000 : f32
    %96 = vector.broadcast %cst_25 : f32 to vector<1x8xf32>
    %97 = arith.select %95, %42, %96 : vector<1x8xi1>, vector<1x8xf32>
    %98 = vector.shape_cast %97 : vector<1x8xf32> to vector<1x1x8xf32>
    %cst_26 = arith.constant dense<0x7F800000> : vector<1xf32>
    %99 = vector.multi_reduction <minimumf>, %98, %cst_26 [1, 2] : vector<1x1x8xf32> to vector<1xf32>
    %100 = vector.shape_cast %99 : vector<1xf32> to vector<1x1x1xf32>
    %101 = vector.extract %100[0, 0, 0] : f32 from vector<1x1x1xf32>
    %102 = arith.select %90, %101, %3 : f32
    %103 = arith.subf %3, %102 : f32
    %104 = arith.mulf %103, %103 : f32
    %cst_27 = arith.constant 0.000000e+00 : f32
    %105 = arith.select %90, %104, %cst_27 : f32
    %cst_28 = arith.constant 5.000000e-01 : f32
    %106 = arith.subf %3, %cst_28 : f32
    %107 = math.absf %106 : f32
    %cst_29 = arith.constant 1.000000e-01 : f32
    %108 = arith.subf %107, %cst_29 : f32
    %cst_30 = arith.constant 0.000000e+00 : f32
    %109 = arith.maximumf %108, %cst_30 : f32
    %cst_31 = arith.constant 2.000000e-01 : f32
    %110 = arith.mulf %cst_31, %80 : f32
    %111 = arith.addf %66, %110 : f32
    %cst_32 = arith.constant 2.000000e-01 : f32
    %112 = arith.mulf %cst_32, %105 : f32
    %113 = arith.addf %111, %112 : f32
    %cst_33 = arith.constant 1.000000e-01 : f32
    %114 = arith.mulf %cst_33, %109 : f32
    %115 = arith.addf %113, %114 : f32
    %116 = vector.broadcast %115 : f32 to vector<1x1xf32>
    %c0_34 = arith.constant 0 : index
    %c0_35 = arith.constant 0 : index
    %117 = vector.load %arg2[%c0_34, %c0_35] : memref<1x1xf32, #tpu.memory_space<vmem>>, vector<1x1xf32>
    tpu.vector_store %arg2[%c0_34, %c0_35], %116 {strides = array<i32>} : memref<1x1xf32, #tpu.memory_space<vmem>>, vector<1x1xf32>,
    return
  }
}

</mosaic_0001>

<bundles_post_ra>
// kernel: tpu_custom_call.1
= control target key start
LH: loop header
LB: loop body
LE: loop exit
PB: predicated region body
PF: predicated region fallthrough
CT: control target
= control target key end

     0   :  { %8 = vsyncpa [#allocation4], 0  ;;  %s466_s0 = inlined_call_operand.hbm [shape: f32[3,8], index: 0, kind: input, shape index: {}]   ;;  %s467_s1 = inlined_call_operand.<no memory space> [shape: f32[1,1], index: 1, kind: input, shape index: {}]   ;;  %s468_s2 = inlined_call_operand.hbm [shape: f32[1,1], index: 2, kind: output, shape index: {}]  }
   0x1   :  { %9 = vsyncpa [#allocation5], 0  ;;  %s361_s9 = smov [#allocation3]   ;;  %s289_s13 = scalar_lea.hbm %s466_s0, 64 }
   0x2   :  { %s16_s10 = sshll.u32 %s361_s9, 4  ;;  %p290_p0 = scmp.ne.s32.totalorder %s466_s0, %s289_s13  ;;  %s17_s10 = int_to_ptr.vmem [resolvable:$true] %s16_s10 }
   0x3   :  { %p293_p1 = scmp.lt.u32.totalorder %s289_s13, %s466_s0 }
   0x5   :  { %p295_p2 = pnand %p293_p1, %p290_p0 }
   0x7   :  { %298 = shalt.err (!%p295_p2)
}
   0x8   :  { %s299_s18 = scalar_lea.vmem %s17_s10, 64  ;;  %p304_p4 = scmp.lt.s32.totalorder %s17_s10, %s17_s10 }
   0x9   :  { %p300_p3 = scmp.ne.s32.totalorder %s17_s10, %s299_s18  ;;  %p305_p5 = scmp.lt.s32.totalorder %s299_s18, %s299_s18 }
   0xb   :  { %p306_p6 = por %p305_p5, %p304_p4 }
   0xd   :  { %p307_p7 = pnand %p306_p6, %p300_p3 }
   0xf   :  { %310 = shalt.err (!%p307_p7)
}
  0x10   :  { %19 = dma.hbm_to_vmem [thread:$0]  %s466_s0, 64, %s17_s10, [#allocation4]  }
  0x11   :  { %345 = dma.done.wait [#allocation4], 64  }
  0x12   :  { %346 = vsyncadd [#allocation4], 4294967232  ;;  %v25_v0 = vld [vmem:[#allocation3] sm:$0x1]  ;;  %v26_v1 = vld [vmem:[#allocation3 + $0x1] sm:$0x1]  ;;  %v66_v38 = vstv %s467_s1 }
  0x13   :  { %v29_v2 = vmax.f32 %v25_v0, %v26_v1  ;;  %v56_v3 = vand.u32 2147483647, %v26_v1  ;;  %v138_v4 = vshra.s32 %v26_v1, 31  ;;  %v27_v17 = vld [vmem:[#allocation3 + $0x2] sm:$0x1]  ;;  %v42_v21 = vsub.f32 %v26_v1, %v25_v0  ;;  %s362_s0 = smov 1  }
  0x14   :  { %v72_v28 = vmax.f32 %v26_v1, 0.0  ;;  %v73_v29 = vmul.f32 %v27_v17, %v26_v1  ;;  %vm63_vm0 = vcmp.ge.f32.partialorder %v26_v1, 0.0  ;;  %v85_v49 = vadd.f32 1.0, %v27_v17  ;;  %s364_s23 = smov 127   ;;  %s415_s6 = smov 2139095040  }
  0x15   :  { %v30_v5 = vsub.f32 %v25_v0, %v29_v2  ;;  %v33_v6 = vsub.f32 %v26_v1, %v29_v2  ;;  %v139_v7 = vand.u32 2147483647, %v138_v4  ;;  %v57_v8 = vsub.f32 0.0, %v56_v3  ;;  %s417_s7 = smov 2155872255   ;;  %s419_s8 = smov 0  }
  0x16   :  { %v43_v26 = vmul.f32 %v42_v21, %v27_v17  ;;  %v74_v39 = vsub.f32 %v72_v28, %v73_v29  ;;  %v363_v52 = vmov 0.0   ;;  %vm90_vm3 = vcmask 57344  }
  0x17   :  { %v31_v9 = vmul.f32 1.442695, %v30_v5  ;;  %v34_v10 = vmul.f32 1.442695, %v33_v6  ;;  %v395_v11 = vxor.u32 %v139_v7, %v26_v1  ;;  %v58_v12 = vmul.f32 1.442695, %v57_v8 }
  0x18   :  { %v44_v35 = vadd.f32 %v43_v26, %v25_v0  ;;  %v102_v62 = vsel %vm90_vm3, %v27_v17, 0.0  ;;  %vm125_vm4 = vcmask 49152  }
  0x19   :  { %275 = vpow2.f32 %v31_v9 }
  0x1a   :  { %277 = vpow2.f32 %v34_v10 }
  0x1b   :  { %279 = vpow2.f32 %v58_v12 }
  0x23   :  { %v276_v13 = vpop.eup %275 }
  0x24   :  { %v278_v14 = vpop.eup %277 }
  0x25   :  { %v36_v15 = vadd.f32 %v278_v14, %v276_v13  ;;  %v280_v16 = vpop.eup %279  ;;  %v46_v18 = vsub.f32 %v278_v14, %v276_v13 }
  0x26   :  { %v60_v19 = vadd.f32 1.0, %v280_v16  ;;  %v78_v23 = vmul.f32 -0.5, %v280_v16  ;;  %v81_v32 = vand.u32 2147483647, %v280_v16 }
  0x27   :  { %281 = vrcp.f32 %v36_v15  ;;  %v47_v20 = vmul.f32 %v46_v18, %v27_v17 }
  0x28   :  { %283 = vlog2.f32 %v36_v15  ;;  %v79_v30 = vadd.f32 1.0, %v78_v23  ;;  %vm82_vm1 = vcmp.lt.f32.partialorder %v81_v32, 0.0004427343 }
  0x29   :  { %285 = vrcp.f32 %v60_v19  ;;  %v48_v22 = vadd.f32 %v276_v13, %v47_v20 }
  0x2a   :  { %287 = vlog2.f32 %v60_v19  ;;  %v80_v40 = vmul.f32 %v280_v16, %v79_v30 }
  0x31   :  { %v282_v24 = vpop.eup %281 }
  0x32   :  { %v55_v25 = vmul.f32 %v282_v24, %v278_v14  ;;  %v49_v27 = vmul.f32 %v282_v24, %v48_v22  ;;  %v284_v33 = vpop.eup %283 }
  0x33   :  { %v40_v34 = vmul.f32 0.6931472, %v284_v33  ;;  %v286_v37 = vpop.eup %285 }
  0x34   :  { %116 = vrot.lane.b32.xlu0 %v55_v25, %s362_s0  ;;  %v50_v31 = vsub.f32 1.0, %v49_v27  ;;  %v288_v41 = vpop.eup %287  ;;  %v64_v44 = vmul.f32 %v286_v37, %v280_v16 }
  0x35   :  { %v41_v42 = vadd.f32 %v40_v34, %v29_v2  ;;  %v77_v45 = vmul.f32 0.6931472, %v288_v41 }
  0x36   :  { %v51_v36 = vmax.f32 %v50_v31, 0.0  ;;  %v400_v48 = vsel %vm63_vm0, %v286_v37, %v64_v44 }
  0x37   :  { %v45_v46 = vsub.f32 %v41_v42, %v44_v35  ;;  %vm67_vm2 = vcmp.gt.f32.partialorder %v400_v48, %v66_v38  ;;  %v83_v50 = vsel %vm82_vm1, %v80_v40, %v77_v45 }
  0x38   :  { %v52_v43 = vmul.f32 %v51_v36, %v51_v36  ;;  %v231_v53 = vsel %vm67_vm2, 1.0, %v363_v52  ;;  %v84_v54 = vadd.f32 %v83_v50, %v74_v39 }
  0x39   :  { %v70_v55 = vsub.f32 %v27_v17, %v231_v53 }
  0x3a   :  { %v53_v47 = vmul.f32 0.25, %v52_v43 }
  0x3b   :  { %v71_v57 = vand.u32 2147483647, %v70_v55 }
  0x3c   :  { %v54_v51 = vmul.f32 %v53_v47, %v45_v46 }
  0x3d   :  { %v88_v59 = vmul.f32 30.0, %v71_v57 }
  0x3e   :  { %v86_v56 = vmul.f32 %v85_v49, %v54_v51 }
  0x40   :  { %v87_v58 = vadd.f32 %v86_v56, %v84_v54 }
  0x42   :  { %v89_v60 = vadd.f32 %v88_v59, %v87_v58 }
  0x44   :  { %v91_v61 = vsel %vm90_vm3, %v89_v60, 0.0 }
  0x45   :  { %92 = vadd.xlane.f32.xlu1 %v91_v61 }
  0x49   :  { %103 = vadd.xlane.f32.xlu1 %v102_v62 }
  0xa6   :  { %v117_v63 = vpop.permute.xlu0 %116 }
  0xa7   :  { %v119_v0 = vsub.f32 %v55_v25, %v117_v63 }
  0xa9   :  { %v120_v1 = vand.u32 2147483647, %v119_v0 }
  0xab   :  { %122 = vrot.lane.b32.xlu0 %v120_v1, %s364_s23 }
  0xd2   :  { %v93_v2 = vpop.xlane.xlu1 %92 }
  0xd3   :  { %v94_v3 = vrot.slane %v93_v2, 4 }
  0xd5   :  { %v95_v4 = vadd.f32 %v94_v3, %v93_v2 }
  0xd6   :  { %v104_v9 = vpop.xlane.xlu1 %103 }
  0xd7   :  { %v96_v5 = vrot.slane %v95_v4, 2  ;;  %v105_v10 = vrot.slane %v104_v9, 4 }
  0xd9   :  { %v97_v6 = vadd.f32 %v96_v5, %v95_v4  ;;  %v106_v12 = vadd.f32 %v105_v10, %v104_v9 }
  0xdb   :  { %v98_v7 = vrot.slane %v97_v6, 1  ;;  %v107_v15 = vrot.slane %v106_v12, 2 }
  0xdd   :  { %v99_v8 = vadd.f32 %v98_v7, %v97_v6  ;;  %v108_v16 = vadd.f32 %v107_v15, %v106_v12 }
  0xdf   :  { %234 = vpush %v99_v8  ;;  %v109_v17 = vrot.slane %v108_v16, 1 }
  0xe1   :  { %v110_v18 = vadd.f32 %v109_v17, %v108_v16 }
  0xe3   :  { %236 = vpush %v110_v18 }
 0x110   :  { %s405_s24 = spop %234 }
 0x111   :  { %s101_s25 = smul.f32 0.125, %s405_s24 }
 0x114   :  { %s237_s26 = spop %236 }
 0x115   :  { %s114_s27 = smul.f32 0.125, %s237_s26 }
 0x117   :  { %s141_s28 = ssub.f32 1.0, %s114_s27 }
 0x119   :  { %s142_s29 = smul.f32 8.0, %s141_s28 }
 0x11b   :  { %s408_s30 = sfloor.f32 %s142_s29 }
 0x11c   :  { %p144_p8 = scmp.lt.f32.partialorder %s408_s30, 8.0  ;;  %s145_s3 = sadd.f32 1.0, %s408_s30 }
 0x11d   :  { %v123_v13 = vpop.permute.xlu0 %122 }
 0x11e   :  { %v126_v14 = vsel %vm125_vm4, %v123_v13, 0.0 }
 0x11f   :  { %127 = vadd.xlane.f32.xlu0 %v126_v14 }
 0x1ac   :  { %v128_v19 = vpop.xlane.xlu0 %127 }
 0x1ad   :  { %v129_v20 = vrot.slane %v128_v19, 4 }
 0x1af   :  { %v130_v21 = vadd.f32 %v129_v20, %v128_v19 }
 0x1b1   :  { %v131_v22 = vrot.slane %v130_v21, 2 }
 0x1b3   :  { %v132_v23 = vadd.f32 %v131_v22, %v130_v21 }
 0x1b5   :  { %v133_v24 = vrot.slane %v132_v23, 1 }
 0x1b7   :  { %v134_v25 = vadd.f32 %v133_v24, %v132_v23 }
 0x1b9   :  { %238 = vpush %v134_v25 }
 0x1ea   :  { %s412_s4 = spop %238 }
 0x1eb   :  { %s136_s5 = smul.f32 0.14285715, %s412_s4 }
 0x1ec LB: > { %s154_s9 = sand.u32 %s351_s6, %s355_s7  ;;  %s155_s10 = sxor.u32 %s351_s6, %s355_s7  ;;  %v365_v27 = vmov 0.0   ;;  %s359_s8 = sphi %s419_s8, %s151_s8   ;;  %s355_s7 = sphi %s417_s7, %s471_s7   ;;  %s351_s6 = sphi %s415_s6, %s469_s6  }
 0x1ed   : > { %s156_s11 = sshra.s32 %s155_s10, 1  ;;  %s151_s8 = sadd.s32 1, %s359_s8  }
 0x1ee   : > { %s157_s12 = sadd.s32 %s156_s11, %s154_s9  ;;  %p148_p10 = scmp.ge.s32.totalorder %s151_s8, 34  }
 0x1ef   : > { %v158_v26 = vstv %s157_s12  ;;  %s172_s13 = sadd.s32 1, %s157_s12  ;;  %s232_s17 = sadd.f32 (%p148_p10), -0.5, %s467_s1  ;;  %vm203_vm7 = vcmask (%p148_p10), 0  }
 0x1f0   : > { %vm159_vm5 = vcmp.le.s32.totalorder %v395_v11, %v158_v26  ;;  %s196_s22 = smul.f32 (%p148_p10), 0.2, %s136_s5  ;;  %s366_s29 = smov (%p148_p10), 0.0  }
 0x1f1   : > { %v160_v28 = vsel %vm159_vm5, 1.0, %v365_v27  ;;  %s193_s18 = sand.u32 (%p148_p10), 2147483647, %s232_s17  ;;  %s367_s10 = smov (%p148_p10), [#allocation6]  }
 0x1f2   : > { %v161_v29 = vsel %vm90_vm3, %v160_v28, 0.0  ;;  %s233_s20 = sadd.f32 (%p148_p10), -0.1, %s193_s18  ;;  %s211_s11 = sshll.u32 (%p148_p10), %s367_s10, 4  ;;  %s212_s11 = int_to_ptr.vmem [resolvable:$true] %s211_s11 }
 0x1f3   : > { %162 = vadd.xlane.f32.xlu0 %v161_v29  ;;  %s311_s4 = scalar_lea.vmem (%p148_p10), %s212_s11, 16  ;;  %p316_p12 = scmp.lt.s32.totalorder (%p148_p10), %s212_s11, %s212_s11 }
 0x1f4   :  { %p312_p11 = scmp.ne.s32.totalorder (%p148_p10), %s212_s11, %s311_s4 }
 0x280   : > { %v163_v30 = vpop.xlane.xlu0 %162 }
 0x281   : > { %v164_v31 = vrot.slane %v163_v30, 4 }
 0x283   : > { %v165_v32 = vadd.f32 %v164_v31, %v163_v30 }
 0x285   : > { %v166_v33 = vrot.slane %v165_v32, 2 }
 0x287   : > { %v167_v34 = vadd.f32 %v166_v33, %v165_v32 }
 0x289   : > { %v168_v35 = vrot.slane %v167_v34, 1 }
 0x28b   : > { %v169_v36 = vadd.f32 %v168_v35, %v167_v34 }
 0x28d   : > { %240 = vpush %v169_v36 }
 0x2bc   :  { %150 = sbr.rel (!%p148_p10) target bundleno = 492 (0x1ec), region = 39 }
 0x2be   : > { %s241_s14 = spop %240 }
 0x2bf   : > { %p171_p9 = scmp.ge.f32.partialorder %s241_s14, %s145_s3  ;;  %s195_s3 = smax.f32 (%p148_p10), %s366_s29, %s233_s20 }
 0x2c1   : > { %s471_s7 = smov (!%p171_p9, %s355_s7), %s172_s13  ;;  %s473_s12 = smov (!%p171_p9, %s157_s12), %s351_s6 }
 0x2c2   : > { %s469_s6 = smov %s473_s12  ;;  %v175_v37 = vstv (%p148_p10), %s473_s12  ;;  %s200_s7 = smul.f32 (%p148_p10), 0.1, %s195_s3 }
 0x2c3   :  { %vm176_vm6 = vcmp.ge.s32.totalorder %v395_v11, %v175_v37  ;;  %s197_s6 = sadd.f32 %s196_s22, %s101_s25 }
 0x2c4   :  { %v177_v38 = vsel %vm176_vm6, %v400_v48, inf }
 0x2c5   :  { %v178_v39 = vsel %vm90_vm3, %v177_v38, inf }
 0x2c6   :  { %179 = vmin.xlane.f32.xlu0 %v178_v39 }
 0x353   :  { %v180_v40 = vpop.xlane.xlu0 %179 }
 0x354   :  { %v181_v41 = vrot.slane %v180_v40, 4 }
 0x356   :  { %v182_v42 = vmin.f32 %v180_v40, %v181_v41 }
 0x358   :  { %v183_v43 = vrot.slane %v182_v42, 2 }
 0x35a   :  { %v184_v44 = vmin.f32 %v182_v42, %v183_v43 }
 0x35c   :  { %v185_v45 = vrot.slane %v184_v44, 1 }
 0x35e   :  { %v186_v46 = vmin.f32 %v184_v44, %v185_v45 }
 0x360   :  { %242 = vpush %v186_v46 }
 0x391   :  { %s243_s19 = spop %242 }
 0x392   :  { %s475_s19 = smov (!%p144_p8, %s243_s19), %s467_s1 }
 0x393   :  { %s189_s27 = ssub.f32 %s467_s1, %s475_s19  ;;  %s315_s1 = scalar_lea.vmem %s212_s11, 32 }
 0x394   :  { %p317_p13 = scmp.lt.s32.totalorder %s315_s1, %s311_s4 }
 0x395   :  { %s190_s28 = smul.f32 %s189_s27, %s189_s27 }
 0x396   :  { %p318_p0 = por %p317_p13, %p316_p12 }
 0x397   :  { %s477_s28 = smov (!%p144_p8, %s190_s28), 0.0 }
 0x398   :  { %s198_s8 = smul.f32 0.2, %s477_s28  ;;  %p319_p1 = pnand %p318_p0, %p312_p11 }
 0x39a   :  { %s199_s9 = sadd.f32 %s198_s8, %s197_s6 }
 0x39c   :  { %s201_s12 = sadd.f32 %s200_s7, %s199_s9 }
 0x39e   :  { %v202_v11 = vstv %s201_s12 }
 0x39f   :  { %204 = vst.msk [vmem:[#allocation6] sm:$0x1] %vm203_vm7, %v202_v11 }
 0x3a0   :  { %322 = shalt.err (!%p319_p1)
}
 0x3a1   :  { %s323_s30 = scalar_lea.hbm %s468_s2, 16 }
 0x3a2   :  { %p324_p2 = scmp.ne.s32.totalorder %s468_s2, %s323_s30  ;;  %p327_p3 = scmp.lt.u32.totalorder %s323_s30, %s468_s2 }
 0x3a4   :  { %p329_p4 = pnand %p327_p3, %p324_p2 }
 0x3a6   :  { %332 = shalt.err (!%p329_p4)
}
 0x3a7   :  { %214 = dma.vmem_to_hbm [thread:$0]  %s212_s11, 16, %s468_s2, [#allocation5]  }
 0x3a8   :  { %347 = dma.done.wait [#allocation5], 16  }
 0x3a9   :  { %348 = vsyncadd [#allocation5], 4294967280 }
 0x3aa   :  { %218 = vsyncpa [#allocation4], 1 }
 0x3ab   :  { %219 = vsyncpa [#allocation5], 1 }

</bundles_post_ra>
